<compile_context>
chip_gen: v7x
topology: tpu7x:2x2x1
jax: 0.10.0
libtpu: 0.0.40
codegen_flags: <defaults>
</compile_context>

<pallas_src>
import functools

import jax
import jax.numpy as jnp
from jax.experimental import pallas as pl
from jax.experimental.pallas import tpu as pltpu

LANE = 128     # vreg lane width
SUBLANE = 8    # vreg sublane width (f32)
TM_MAX = 512   # batch tile cap: safe for v7x 64 MiB VMEM, big enough for v5e/v6e roofline


def _round_up(v, m):
    return (v + m - 1) // m * m


def mlp_kernel(x_ref, w1_ref, b1_ref, w2_ref, b2_ref, w3_ref, b3_ref, o_ref):
    # One (TM, D) batch tile per grid step; weights/biases are full-array
    # blocks with constant index_map (VMEM-resident across the whole grid).
    x = x_ref[...].astype(jnp.bfloat16)                       # (TM, D) -> bf16 for MXU
    h1 = jnp.dot(x, w1_ref[...], preferred_element_type=jnp.float32) + b1_ref[...]
    h1 = jnp.maximum(h1, 0.0).astype(jnp.bfloat16)            # ReLU, bf16 for next MXU op
    h2 = jnp.dot(h1, w2_ref[...], preferred_element_type=jnp.float32) + b2_ref[...]
    h2 = jnp.maximum(h2, 0.0).astype(jnp.bfloat16)
    o_ref[...] = (jnp.dot(h2, w3_ref[...], preferred_element_type=jnp.float32)
                  + b3_ref[...]).astype(o_ref.dtype)


def mlp_forward(x_nchw, packed):
    """x_nchw: (B, nc, sz, sz) float32. packed: dict from pack_params()."""
    B = x_nchw.shape[0]
    D = x_nchw.shape[1] * x_nchw.shape[2] * x_nchw.shape[3]
    num_classes = packed["num_classes"]

    w1, b1 = packed["w1"], packed["b1"]     # (Dp, H) bf16, (1, H) f32
    w2, b2 = packed["w2"], packed["b2"]     # (H, H) bf16,  (1, H) f32
    w3, b3 = packed["w3"], packed["b3"]     # (H, C) bf16,  (1, C) f32
    Dp = w1.shape[0]
    H = w1.shape[1]
    C = w3.shape[1]

    # Flatten exactly like torch .view(-1, nc*sz*sz), pad D (lane) and B (tile).
    x2d = x_nchw.reshape(B, D).astype(jnp.float32)
    if Dp != D:
        x2d = jnp.pad(x2d, ((0, 0), (0, Dp - D)))

    Bp = _round_up(max(B, SUBLANE), SUBLANE)
    TM = min(TM_MAX, Bp)
    Bp = _round_up(Bp, TM)
    if Bp != B:
        x2d = jnp.pad(x2d, ((0, Bp - B), (0, 0)))
    grid = (Bp // TM,)

    cost = pl.CostEstimate(
        flops=2 * Bp * (Dp * H + H * H + H * C),
        transcendentals=0,
        bytes_accessed=(x2d.size * 4
                        + (w1.size + w2.size + w3.size) * 2
                        + (b1.size + b2.size + b3.size) * 4
                        + Bp * C * 4),
    )

    const = lambda i: (0, 0)  # weights/biases: same block every grid step
    out = pl.pallas_call(
        mlp_kernel,
        out_shape=jax.ShapeDtypeStruct((Bp, C), jnp.float32),
        grid_spec=pltpu.PrefetchScalarGridSpec(
            num_scalar_prefetch=0,
            grid=grid,
            in_specs=[
                pl.BlockSpec((TM, Dp), lambda i: (i, 0)),   # x: streamed per tile
                pl.BlockSpec((Dp, H), const),               # w1
                pl.BlockSpec((1, H), const),                # b1
                pl.BlockSpec((H, H), const),                # w2
                pl.BlockSpec((1, H), const),                # b2
                pl.BlockSpec((H, C), const),                # w3
                pl.BlockSpec((1, C), const),                # b3
            ],
            out_specs=pl.BlockSpec((TM, C), lambda i: (i, 0)),
        ),
        compiler_params=pltpu.CompilerParams(
            dimension_semantics=("parallel",),      # shards batch tiles across v7x's 2 TCs
            vmem_limit_bytes=32 * 1024 * 1024,      # explicit (covers v5e's 16 MiB default)
        ),
        cost_estimate=cost,
    )(x2d, w1, b1, w2, b2, w3, b3)

    # Drop batch padding and padded (zero) logit columns.
    return out[:B, :num_classes]


def init_params(key, nc=3, sz=32, num_classes=10, hidden=100):
    """Deterministic f32 init mimicking nn.Linear default (uniform +-1/sqrt(fan_in)).
    Weights stored transposed (in_features, out_features)."""
    D = nc * sz * sz
    k = jax.random.split(key, 6)

    def lin(kw, kb, fan_in, fan_out):
        bound = 1.0 / jnp.sqrt(fan_in)
        w = jax.random.uniform(kw, (fan_in, fan_out), jnp.float32, -bound, bound)
        b = jax.random.uniform(kb, (1, fan_out), jnp.float32, -bound, bound)
        return w, b

    w1, b1 = lin(k[0], k[1], D, hidden)
    w2, b2 = lin(k[2], k[3], hidden, hidden)
    w3, b3 = lin(k[4], k[5], hidden, num_classes)
    return {"w1": w1, "b1": b1, "w2": w2, "b2": b2, "w3": w3, "b3": b3,
            "num_classes": num_classes, "hidden": hidden, "D": D}


def pack_params(params):
    """Zero-pad feature dims to multiples of 128 (lane width) and cast weights
    to bfloat16 for storage/DMA. Biases stay f32 (added after f32 accumulation)."""
    D, hidden, num_classes = params["D"], params["hidden"], params["num_classes"]
    Dp = _round_up(D, LANE)
    H = _round_up(hidden, LANE)
    C = _round_up(num_classes, LANE)

    def pad_w(w, r, c):
        return jnp.pad(w, ((0, r - w.shape[0]), (0, c - w.shape[1])))

    def pad_b(b, c):
        return jnp.pad(b, ((0, 0), (0, c - b.shape[1])))

    return {
        "w1": pad_w(params["w1"], Dp, H).astype(jnp.bfloat16),
        "b1": pad_b(params["b1"], H).astype(jnp.float32),
        "w2": pad_w(params["w2"], H, H).astype(jnp.bfloat16),
        "b2": pad_b(params["b2"], H).astype(jnp.float32),
        "w3": pad_w(params["w3"], H, C).astype(jnp.bfloat16),
        "b3": pad_b(params["b3"], C).astype(jnp.float32),
        "num_classes": num_classes,
    }


if __name__ == "__main__":
    key = jax.random.PRNGKey(0)
    kx, kp = jax.random.split(key)

    nc, sz, num_classes, batch = 3, 32, 10, 8
    x = jax.random.normal(kx, (batch, nc, sz, sz), dtype=jnp.float32)
    params = init_params(kp, nc=nc, sz=sz, num_classes=num_classes)
    packed = pack_params(params)

    out = mlp_forward(x, packed)
    out = jax.block_until_ready(out)
    assert out.shape == (batch, num_classes)

    # Reference in plain JAX mirroring the kernel's bf16-weight / f32-accumulate math
    # (zero padding of hidden/class columns contributes exactly zero).
    f32 = jnp.float32
    x16 = x.reshape(batch, nc * sz * sz).astype(jnp.bfloat16).astype(f32)
    w1f, w2f, w3f = (packed["w1"][:x16.shape[1]].astype(f32),
                     packed["w2"].astype(f32), packed["w3"].astype(f32))
    h1 = jnp.maximum(x16 @ w1f + packed["b1"], 0.0).astype(jnp.bfloat16).astype(f32)
    h2 = jnp.maximum(h1 @ w2f + packed["b2"], 0.0).astype(jnp.bfloat16).astype(f32)
    ref = (h2 @ w3f + packed["b3"])[:, :num_classes]
    assert jnp.allclose(out, ref, atol=1e-3, rtol=1e-3), (
        float(jnp.max(jnp.abs(out - ref))))

    print("KERNEL_OK")
</pallas_src>

<mosaic_0001>
module attributes {stable_mosaic.version = 11 : i64} {
  func.func @mlp_kernel(%arg0: i32, %arg1: memref<8x3072xf32, #tpu.memory_space<vmem>>, %arg2: memref<3072x128xbf16, #tpu.memory_space<vmem>>, %arg3: memref<1x128xf32, #tpu.memory_space<vmem>>, %arg4: memref<128x128xbf16, #tpu.memory_space<vmem>>, %arg5: memref<1x128xf32, #tpu.memory_space<vmem>>, %arg6: memref<128x128xbf16, #tpu.memory_space<vmem>>, %arg7: memref<1x128xf32, #tpu.memory_space<vmem>>, %arg8: memref<8x128xf32, #tpu.memory_space<vmem>>) attributes {dimension_semantics = [#tpu.dimension_semantics<parallel>], iteration_bounds = array<i64: 1>, scalar_prefetch = 0 : i64, scratch_operands = 0 : i64, tpu.core_type = #tpu.core_type<tc>, window_params = [{transform_indices = @transform_0, window_bounds = array<i64: 8, 3072>}, {pipeline_mode = #tpu.pipeline_mode<synchronous>, transform_indices = @transform_1, window_bounds = array<i64: 3072, 128>}, {pipeline_mode = #tpu.pipeline_mode<synchronous>, transform_indices = @transform_2, window_bounds = array<i64: 1, 128>}, {pipeline_mode = #tpu.pipeline_mode<synchronous>, transform_indices = @transform_3, window_bounds = array<i64: 128, 128>}, {pipeline_mode = #tpu.pipeline_mode<synchronous>, transform_indices = @transform_4, window_bounds = array<i64: 1, 128>}, {pipeline_mode = #tpu.pipeline_mode<synchronous>, transform_indices = @transform_5, window_bounds = array<i64: 128, 128>}, {pipeline_mode = #tpu.pipeline_mode<synchronous>, transform_indices = @transform_6, window_bounds = array<i64: 1, 128>}, {transform_indices = @transform_7, window_bounds = array<i64: 8, 128>}]} {
    %c0 = arith.constant 0 : index
    %c0_0 = arith.constant 0 : index
    %0 = vector.load %arg1[%c0, %c0_0] : memref<8x3072xf32, #tpu.memory_space<vmem>>, vector<8x3072xf32>
    %1 = arith.truncf %0 : vector<8x3072xf32> to vector<8x3072xbf16>
    %c0_1 = arith.constant 0 : index
    %c0_2 = arith.constant 0 : index
    %2 = vector.load %arg2[%c0_1, %c0_2] : memref<3072x128xbf16, #tpu.memory_space<vmem>>, vector<3072x128xbf16>
    %cst = arith.constant dense<0.000000e+00> : vector<8x128xf32>
    %3 = tpu.matmul %1, %2, %cst {dimension_numbers = #tpu.dot_dimension_numbers<[1], [0], [0], [1], [0, 0, 1, 1], [], []>} : vector<8x3072xbf16>, vector<3072x128xbf16>, vector<8x128xf32> -> vector<8x128xf32>
    %c0_3 = arith.constant 0 : index
    %c0_4 = arith.constant 0 : index
    %4 = vector.load %arg3[%c0_3, %c0_4] : memref<1x128xf32, #tpu.memory_space<vmem>>, vector<1x128xf32>
    %5 = vector.broadcast %4 : vector<1x128xf32> to vector<8x128xf32>
    %6 = arith.addf %3, %5 : vector<8x128xf32>
    %cst_5 = arith.constant 0.000000e+00 : f32
    %7 = vector.broadcast %cst_5 : f32 to vector<8x128xf32>
    %8 = arith.maximumf %6, %7 : vector<8x128xf32>
    %9 = arith.truncf %8 : vector<8x128xf32> to vector<8x128xbf16>
    %c0_6 = arith.constant 0 : index
    %c0_7 = arith.constant 0 : index
    %10 = vector.load %arg4[%c0_6, %c0_7] : memref<128x128xbf16, #tpu.memory_space<vmem>>, vector<128x128xbf16>
    %cst_8 = arith.constant dense<0.000000e+00> : vector<8x128xf32>
    %11 = tpu.matmul %9, %10, %cst_8 {dimension_numbers = #tpu.dot_dimension_numbers<[1], [0], [0], [1], [0, 0, 1, 1], [], []>} : vector<8x128xbf16>, vector<128x128xbf16>, vector<8x128xf32> -> vector<8x128xf32>
    %c0_9 = arith.constant 0 : index
    %c0_10 = arith.constant 0 : index
    %12 = vector.load %arg5[%c0_9, %c0_10] : memref<1x128xf32, #tpu.memory_space<vmem>>, vector<1x128xf32>
    %13 = vector.broadcast %12 : vector<1x128xf32> to vector<8x128xf32>
    %14 = arith.addf %11, %13 : vector<8x128xf32>
    %cst_11 = arith.constant 0.000000e+00 : f32
    %15 = vector.broadcast %cst_11 : f32 to vector<8x128xf32>
    %16 = arith.maximumf %14, %15 : vector<8x128xf32>
    %17 = arith.truncf %16 : vector<8x128xf32> to vector<8x128xbf16>
    %c0_12 = arith.constant 0 : index
    %c0_13 = arith.constant 0 : index
    %18 = vector.load %arg6[%c0_12, %c0_13] : memref<128x128xbf16, #tpu.memory_space<vmem>>, vector<128x128xbf16>
    %cst_14 = arith.constant dense<0.000000e+00> : vector<8x128xf32>
    %19 = tpu.matmul %17, %18, %cst_14 {dimension_numbers = #tpu.dot_dimension_numbers<[1], [0], [0], [1], [0, 0, 1, 1], [], []>} : vector<8x128xbf16>, vector<128x128xbf16>, vector<8x128xf32> -> vector<8x128xf32>
    %c0_15 = arith.constant 0 : index
    %c0_16 = arith.constant 0 : index
    %20 = vector.load %arg7[%c0_15, %c0_16] : memref<1x128xf32, #tpu.memory_space<vmem>>, vector<1x128xf32>
    %21 = vector.broadcast %20 : vector<1x128xf32> to vector<8x128xf32>
    %22 = arith.addf %19, %21 : vector<8x128xf32>
    %c0_17 = arith.constant 0 : index
    %c0_18 = arith.constant 0 : index
    %23 = vector.load %arg8[%c0_17, %c0_18] : memref<8x128xf32, #tpu.memory_space<vmem>>, vector<8x128xf32>
    tpu.vector_store %arg8[%c0_17, %c0_18], %22 {strides = array<i32>} : memref<8x128xf32, #tpu.memory_space<vmem>>, vector<8x128xf32>,
    return
  }
  func.func @transform_0(%arg0: i32) -> (i32, i32) {
    %c0_i32 = arith.constant 0 : i32
    %c0_i32_0 = arith.constant 0 : i32
    return %arg0, %c0_i32 : i32, i32
  }
  func.func @transform_1(%arg0: i32) -> (i32, i32) {
    %c0_i32 = arith.constant 0 : i32
    %c0_i32_0 = arith.constant 0 : i32
    %c0_i32_1 = arith.constant 0 : i32
    return %c0_i32, %c0_i32_0 : i32, i32
  }
  func.func @transform_2(%arg0: i32) -> (i32, i32) {
    %c0_i32 = arith.constant 0 : i32
    %c0_i32_0 = arith.constant 0 : i32
    %c0_i32_1 = arith.constant 0 : i32
    return %c0_i32, %c0_i32_0 : i32, i32
  }
  func.func @transform_3(%arg0: i32) -> (i32, i32) {
    %c0_i32 = arith.constant 0 : i32
    %c0_i32_0 = arith.constant 0 : i32
    %c0_i32_1 = arith.constant 0 : i32
    return %c0_i32, %c0_i32_0 : i32, i32
  }
  func.func @transform_4(%arg0: i32) -> (i32, i32) {
    %c0_i32 = arith.constant 0 : i32
    %c0_i32_0 = arith.constant 0 : i32
    %c0_i32_1 = arith.constant 0 : i32
    return %c0_i32, %c0_i32_0 : i32, i32
  }
  func.func @transform_5(%arg0: i32) -> (i32, i32) {
    %c0_i32 = arith.constant 0 : i32
    %c0_i32_0 = arith.constant 0 : i32
    %c0_i32_1 = arith.constant 0 : i32
    return %c0_i32, %c0_i32_0 : i32, i32
  }
  func.func @transform_6(%arg0: i32) -> (i32, i32) {
    %c0_i32 = arith.constant 0 : i32
    %c0_i32_0 = arith.constant 0 : i32
    %c0_i32_1 = arith.constant 0 : i32
    return %c0_i32, %c0_i32_0 : i32, i32
  }
  func.func @transform_7(%arg0: i32) -> (i32, i32) {
    %c0_i32 = arith.constant 0 : i32
    %c0_i32_0 = arith.constant 0 : i32
    return %arg0, %c0_i32 : i32, i32
  }
}

</mosaic_0001>

<bundles_post_ra>
// kernel: tpu_custom_call.1
= control target key start
LH: loop header
LB: loop body
LE: loop exit
PB: predicated region body
PF: predicated region fallthrough
CT: control target
= control target key end

     0   :  { %12 = vsyncpa [#allocation3], 0  ;;  %s3409_s0 = inlined_call_operand.hbm [shape: f32[8,3072], index: 0, kind: input, shape index: {}]   ;;  %s3410_s1 = inlined_call_operand.hbm [shape: bf16[3072,128], index: 1, kind: input, shape index: {}]   ;;  %s3411_s2 = inlined_call_operand.vmem [shape: f32[1,128], index: 2, kind: input, shape index: {}]   ;;  %s3412_s3 = inlined_call_operand.hbm [shape: bf16[128,128], index: 3, kind: input, shape index: {}]   ;;  %s3413_s4 = inlined_call_operand.vmem [shape: f32[1,128], index: 4, kind: input, shape index: {}]   ;;  %s3414_s5 = inlined_call_operand.hbm [shape: bf16[128,128], index: 5, kind: input, shape index: {}]   ;;  %s3415_s6 = inlined_call_operand.vmem [shape: f32[1,128], index: 6, kind: input, shape index: {}]   ;;  %s3416_s7 = inlined_call_operand.hbm [shape: f32[8,128], index: 7, kind: output, shape index: {}]  }
   0x1   :  { %13 = vsyncpa [#allocation6], 0 }
   0x2   :  { %14 = vsyncpa [#allocation9], 0 }
   0x3   :  { %15 = vsyncpa [#allocation4], 0  ;;  %s3264_s24 = smov [#allocation5]   ;;  %s3146_s28 = scalar_lea.hbm %s3410_s1, 24576 }
   0x4   :  { %s31_s25 = sshll.u32 %s3264_s24, 4  ;;  %p3147_p0 = scmp.ne.s32.totalorder %s3410_s1, %s3146_s28  ;;  %s32_s25 = int_to_ptr.vmem [resolvable:$true] %s31_s25 }
   0x5   :  { %p3150_p1 = scmp.lt.u32.totalorder %s3146_s28, %s3410_s1 }
   0x7   :  { %p3152_p2 = pnand %p3150_p1, %p3147_p0 }
   0x9   :  { %3155 = shalt.err (!%p3152_p2)
}
   0xa   :  { %s3156_s10 = scalar_lea.vmem %s32_s25, 24576  ;;  %p3161_p4 = scmp.lt.s32.totalorder %s32_s25, %s32_s25 }
   0xb   :  { %p3157_p3 = scmp.ne.s32.totalorder %s32_s25, %s3156_s10  ;;  %p3162_p5 = scmp.lt.s32.totalorder %s3156_s10, %s3156_s10 }
   0xd   :  { %p3163_p6 = por %p3162_p5, %p3161_p4 }
   0xf   :  { %p3164_p7 = pnand %p3163_p6, %p3157_p3 }
  0x11   :  { %3167 = shalt.err (!%p3164_p7)
}
  0x12   :  { %s3265_s11 = smov 64   ;;  %s3266_s12 = smov 4  }
  0x13   :  { %37 = dma.hbm_to_vmem [thread:$0]  %s3410_s1, 24576, %s32_s25, [#allocation6], %s3265_s11, %s3265_s11, %s3266_s12  }
  0x14   :  { %s3267_s15 = smov [#allocation2]   ;;  %s3268_s17 = smov [#allocation7]  }
  0x15   :  { %s22_s16 = sshll.u32 %s3267_s15, 4  ;;  %s45_s18 = sshll.u32 %s3268_s17, 4  ;;  %s23_s16 = int_to_ptr.vmem [resolvable:$true] %s22_s16  ;;  %s46_s18 = int_to_ptr.vmem [resolvable:$true] %s45_s18 }
  0x16   :  { %s3168_s21 = scalar_lea.hbm %s3409_s0, 3072 }
  0x17   :  { %p3169_p8 = scmp.ne.s32.totalorder %s3409_s0, %s3168_s21  ;;  %p3172_p9 = scmp.lt.u32.totalorder %s3168_s21, %s3409_s0 }
  0x19   :  { %p3174_p10 = pnand %p3172_p9, %p3169_p8 }
  0x1b   :  { %3177 = shalt.err (!%p3174_p10)
}
  0x1c   :  { %s3178_s1 = scalar_lea.vmem %s23_s16, 3072  ;;  %p3183_p12 = scmp.lt.s32.totalorder %s23_s16, %s23_s16 }
  0x1d   :  { %p3179_p11 = scmp.ne.s32.totalorder %s23_s16, %s3178_s1  ;;  %p3184_p13 = scmp.lt.s32.totalorder %s3178_s1, %s3178_s1 }
  0x1f   :  { %p3185_p0 = por %p3184_p13, %p3183_p12 }
  0x21   :  { %p3186_p1 = pnand %p3185_p0, %p3179_p11 }
  0x23   :  { %3189 = shalt.err (!%p3186_p1)
}
  0x24   :  { %25 = dma.hbm_to_vmem [thread:$0]  %s3409_s0, 3072, %s23_s16, [#allocation3]  }
  0x25   :  { %s3190_s30 = scalar_lea.hbm %s3412_s3, 1024 }
  0x26   :  { %p3191_p2 = scmp.ne.s32.totalorder %s3412_s3, %s3190_s30  ;;  %p3194_p3 = scmp.lt.u32.totalorder %s3190_s30, %s3412_s3 }
  0x28   :  { %p3196_p4 = pnand %p3194_p3, %p3191_p2 }
  0x2a   :  { %3199 = shalt.err (!%p3196_p4)
}
  0x2b   :  { %s3200_s14 = scalar_lea.vmem %s46_s18, 1024  ;;  %p3205_p6 = scmp.lt.s32.totalorder %s46_s18, %s46_s18 }
  0x2c   :  { %p3201_p5 = scmp.ne.s32.totalorder %s46_s18, %s3200_s14  ;;  %p3206_p7 = scmp.lt.s32.totalorder %s3200_s14, %s3200_s14 }
  0x2e   :  { %p3207_p8 = por %p3206_p7, %p3205_p6 }
  0x30   :  { %p3208_p9 = pnand %p3207_p8, %p3201_p5 }
  0x32   :  { %3211 = shalt.err (!%p3208_p9)
}
  0x33   :  { %51 = dma.hbm_to_vmem [thread:$0]  %s3412_s3, 1024, %s46_s18, [#allocation6], %s3265_s11, %s3265_s11, %s3266_s12  }
  0x34   :  { %s3269_s16 = smov [#allocation8]   ;;  %s3212_s21 = scalar_lea.hbm %s3414_s5, 1024 }
  0x35   :  { %s59_s17 = sshll.u32 %s3269_s16, 4  ;;  %p3213_p10 = scmp.ne.s32.totalorder %s3414_s5, %s3212_s21  ;;  %s60_s17 = int_to_ptr.vmem [resolvable:$true] %s59_s17 }
  0x36   :  { %p3216_p11 = scmp.lt.u32.totalorder %s3212_s21, %s3414_s5 }
  0x38   :  { %p3218_p12 = pnand %p3216_p11, %p3213_p10 }
  0x3a   :  { %3221 = shalt.err (!%p3218_p12)
}
  0x3b   :  { %s3222_s1 = scalar_lea.vmem %s60_s17, 1024  ;;  %p3227_p0 = scmp.lt.s32.totalorder %s60_s17, %s60_s17 }
  0x3c   :  { %p3223_p13 = scmp.ne.s32.totalorder %s60_s17, %s3222_s1  ;;  %p3228_p1 = scmp.lt.s32.totalorder %s3222_s1, %s3222_s1 }
  0x3e   :  { %p3229_p2 = por %p3228_p1, %p3227_p0 }
  0x40   :  { %p3230_p3 = pnand %p3229_p2, %p3223_p13 }
  0x42   :  { %3233 = shalt.err (!%p3230_p3)
}
  0x43   :  { %65 = dma.hbm_to_vmem [thread:$0]  %s3414_s5, 1024, %s60_s17, [#allocation9], %s3265_s11, %s3265_s11, %s3266_s12  }
  0x44   :  { %3256 = dma.done.wait [#allocation3], 3072  }
  0x45   :  { %3257 = vsyncadd [#allocation3], 4294964224 }
  0x46   :  { %3258 = dma.done.wait [#allocation6], 25600  }
  0x47   :  { %3259 = vsyncadd [#allocation6], 4294941696 }
  0x48   :  { %3260 = dma.done.wait [#allocation9], 1024  }
  0x49   :  { %3261 = vsyncadd [#allocation9], 4294966272  ;;  %v2938_v0 = vld [vmem:[#allocation5 + $0x40] sm:$0xff]   ;;  %v2942_v4 = vld [vmem:[#allocation5 + $0x48] sm:$0xff]   ;;  %vm3271_vm0 = vmmov 0   ;;  %s3272_s28 = smov [#allocation10]  }
  0x4a   :  { %v2939_v1 = vld [vmem:[#allocation5 + $0xc0] sm:$0xff]   ;;  %2607 = vmatprep.subr.bf16.mxu0 %v2938_v0  ;;  %v2943_v5 = vld [vmem:[#allocation5 + $0xc8] sm:$0xff]   ;;  %v2946_v8 = vld [vmem:[#allocation5 + $0x50] sm:$0xff]   ;;  %s2385_s29 = sshll.u32 %s3272_s28, 4  ;;  %s2386_s29 = int_to_ptr.vmem [resolvable:$true] %s2385_s29 }
  0x4b   :  { %v2940_v2 = vld [vmem:[#allocation5] sm:$0xff]   ;;  %2629 = vmatprep.subr.bf16.mxu1 %v2939_v1  ;;  %v2944_v6 = vld [vmem:[#allocation5 + $0x8] sm:$0xff]   ;;  %v2947_v9 = vld [vmem:[#allocation5 + $0xd0] sm:$0xff]   ;;  %p3239_p5 = scmp.lt.s32.totalorder %s2386_s29, %s2386_s29 }
  0x4c   :  { %v2941_v3 = vld [vmem:[#allocation5 + $0x80] sm:$0xff]   ;;  %2608 = vmatpush3.bf16.msra.mxu0 %v2940_v2  ;;  %v2945_v7 = vld [vmem:[#allocation5 + $0x88] sm:$0xff]   ;;  %v2948_v10 = vld [vmem:[#allocation5 + $0x10] sm:$0xff]  }
  0x4d   :  { %2630 = vmatpush3.bf16.msra.mxu1 %v2941_v3  ;;  %2609 = vmatprep.subr.bf16.mxu0 %v2942_v4  ;;  %v2949_v11 = vld [vmem:[#allocation5 + $0x90] sm:$0xff]   ;;  %v2950_v12 = vld [vmem:[#allocation5 + $0x58] sm:$0xff]   ;;  %v2954_v16 = vld [vmem:[#allocation5 + $0x60] sm:$0xff]  }
  0x4e   :  { %2631 = vmatprep.subr.bf16.mxu1 %v2943_v5  ;;  %v2951_v13 = vld [vmem:[#allocation5 + $0xd8] sm:$0xff]   ;;  %v2955_v17 = vld [vmem:[#allocation5 + $0xe0] sm:$0xff]   ;;  %v2958_v20 = vld [vmem:[#allocation5 + $0x68] sm:$0xff]  }
  0x4f   :  { %v2952_v14 = vld [vmem:[#allocation5 + $0x18] sm:$0xff]   ;;  %v2956_v18 = vld [vmem:[#allocation5 + $0x20] sm:$0xff]   ;;  %v2959_v21 = vld [vmem:[#allocation5 + $0xe8] sm:$0xff]  }
  0x50   :  { %2610 = vmatpush3.bf16.msra.mxu0 %v2944_v6  ;;  %v2953_v15 = vld [vmem:[#allocation5 + $0x98] sm:$0xff]   ;;  %v2957_v19 = vld [vmem:[#allocation5 + $0xa0] sm:$0xff]   ;;  %v2960_v22 = vld [vmem:[#allocation5 + $0x28] sm:$0xff]  }
  0x51   :  { %2632 = vmatpush3.bf16.msra.mxu1 %v2945_v7  ;;  %2611 = vmatprep.subr.bf16.mxu0 %v2946_v8  ;;  %v2961_v23 = vld [vmem:[#allocation5 + $0xa8] sm:$0xff]   ;;  %v2962_v24 = vld [vmem:[#allocation5 + $0x70] sm:$0xff]   ;;  %v2966_v28 = vld [vmem:[#allocation5 + $0x78] sm:$0xff]  }
  0x52   :  { %2633 = vmatprep.subr.bf16.mxu1 %v2947_v9  ;;  %v2963_v25 = vld [vmem:[#allocation5 + $0xf0] sm:$0xff]   ;;  %v2967_v29 = vld [vmem:[#allocation5 + $0xf8] sm:$0xff]   ;;  %v82_v32 = vld [vmem:[#allocation2 + $0x8] sm:$0xff] }
  0x53   :  { %v2964_v26 = vld [vmem:[#allocation5 + $0x30] sm:$0xff]   ;;  %v2968_v30 = vld [vmem:[#allocation5 + $0x38] sm:$0xff]   ;;  %v81_v34 = vld [vmem:[#allocation2] sm:$0xff]  ;;  %v106_v35 = vpack.c.bf16 %v82_v32, %v82_v32 }
  0x54   :  { %2612 = vmatpush3.bf16.msra.mxu0 %v2948_v10  ;;  %v2965_v27 = vld [vmem:[#allocation5 + $0xb0] sm:$0xff]   ;;  %v2969_v31 = vld [vmem:[#allocation5 + $0xb8] sm:$0xff]   ;;  %v105_v37 = vpack.c.bf16 %v81_v34, %v81_v34  ;;  %v2970_v40 = vld [vmem:[#allocation5 + $0x140] sm:$0xff]  }
  0x55   :  { %2634 = vmatpush3.bf16.msra.mxu1 %v2949_v11  ;;  %2613 = vmatprep.subr.bf16.mxu0 %v2950_v12  ;;  %v84_v33 = vld [vmem:[#allocation2 + $0x18] sm:$0xff]  ;;  %v83_v38 = vld [vmem:[#allocation2 + $0x10] sm:$0xff]  ;;  %v2971_v41 = vld [vmem:[#allocation5 + $0x1c0] sm:$0xff]  }
  0x56   :  { %2635 = vmatprep.subr.bf16.mxu1 %v2951_v13  ;;  %v108_v36 = vpack.c.bf16 %v84_v33, %v84_v33  ;;  %v107_v39 = vpack.c.bf16 %v83_v38, %v83_v38  ;;  %1704 = vmatprep.mubr.bf16.mxu0 %v106_v35  ;;  %v2972_v42 = vld [vmem:[#allocation5 + $0x100] sm:$0xff]   ;;  %v2974_v44 = vld [vmem:[#allocation5 + $0x148] sm:$0xff]   ;;  %v2978_v48 = vld [vmem:[#allocation5 + $0x150] sm:$0xff]  }
  0x57   :  { %v2973_v43 = vld [vmem:[#allocation5 + $0x180] sm:$0xff]   ;;  %v2975_v45 = vld [vmem:[#allocation5 + $0x1c8] sm:$0xff]   ;;  %v2979_v49 = vld [vmem:[#allocation5 + $0x1d0] sm:$0xff]  }
  0x58   :  { %2614 = vmatpush3.bf16.msra.mxu0 %v2952_v14  ;;  %1744 = vmatprep.mubr.bf16.mxu1 %v108_v36  ;;  %v2976_v46 = vld [vmem:[#allocation5 + $0x108] sm:$0xff]   ;;  %v2980_v50 = vld [vmem:[#allocation5 + $0x110] sm:$0xff]   ;;  %v2982_v52 = vld [vmem:[#allocation5 + $0x158] sm:$0xff]  }
  0x59   :  { %2636 = vmatpush3.bf16.msra.mxu1 %v2953_v15  ;;  %2615 = vmatprep.subr.bf16.mxu0 %v2954_v16  ;;  %v2977_v47 = vld [vmem:[#allocation5 + $0x188] sm:$0xff]   ;;  %v2981_v51 = vld [vmem:[#allocation5 + $0x190] sm:$0xff]   ;;  %v2983_v53 = vld [vmem:[#allocation5 + $0x1d8] sm:$0xff]  }
  0x5a   :  { %2637 = vmatprep.subr.bf16.mxu1 %v2955_v17  ;;  %v2984_v54 = vld [vmem:[#allocation5 + $0x118] sm:$0xff]   ;;  %v2986_v56 = vld [vmem:[#allocation5 + $0x160] sm:$0xff]   ;;  %v2990_v60 = vld [vmem:[#allocation5 + $0x168] sm:$0xff]  }
  0x5b   :  { %v2985_v55 = vld [vmem:[#allocation5 + $0x198] sm:$0xff]   ;;  %v2987_v57 = vld [vmem:[#allocation5 + $0x1e0] sm:$0xff]   ;;  %v2991_v61 = vld [vmem:[#allocation5 + $0x1e8] sm:$0xff]  }
  0x5c   :  { %2616 = vmatpush3.bf16.msra.mxu0 %v2956_v18  ;;  %v2988_v58 = vld [vmem:[#allocation5 + $0x120] sm:$0xff]   ;;  %v2992_v62 = vld [vmem:[#allocation5 + $0x128] sm:$0xff]   ;;  %v2994_v0 = vld [vmem:[#allocation5 + $0x170] sm:$0xff]  }
  0x5d   :  { %2638 = vmatpush3.bf16.msra.mxu1 %v2957_v19  ;;  %2617 = vmatprep.subr.bf16.mxu0 %v2958_v20  ;;  %v2989_v59 = vld [vmem:[#allocation5 + $0x1a0] sm:$0xff]   ;;  %v2993_v63 = vld [vmem:[#allocation5 + $0x1a8] sm:$0xff]   ;;  %v2995_v1 = vld [vmem:[#allocation5 + $0x1f0] sm:$0xff]  }
  0x5e   :  { %2639 = vmatprep.subr.bf16.mxu1 %v2959_v21  ;;  %v2996_v2 = vld [vmem:[#allocation5 + $0x130] sm:$0xff]   ;;  %v2998_v4 = vld [vmem:[#allocation5 + $0x178] sm:$0xff]   ;;  %v86_v8 = vld [vmem:[#allocation2 + $0x28] sm:$0xff] }
  0x5f   :  { %v2997_v3 = vld [vmem:[#allocation5 + $0x1b0] sm:$0xff]   ;;  %v2999_v5 = vld [vmem:[#allocation5 + $0x1f8] sm:$0xff]   ;;  %v110_v10 = vpack.c.bf16 %v86_v8, %v86_v8  ;;  %v85_v12 = vld [vmem:[#allocation2 + $0x20] sm:$0xff] }
  0x60   :  { %2618 = vmatpush3.bf16.msra.mxu0 %v2960_v22  ;;  %v3000_v6 = vld [vmem:[#allocation5 + $0x138] sm:$0xff]   ;;  %v87_v13 = vld [vmem:[#allocation2 + $0x30] sm:$0xff]  ;;  %v109_v14 = vpack.c.bf16 %v85_v12, %v85_v12  ;;  %v3002_v16 = vld [vmem:[#allocation5 + $0x240] sm:$0xff]  }
  0x61   :  { %2640 = vmatpush3.bf16.msra.mxu1 %v2961_v23  ;;  %2619 = vmatprep.subr.bf16.mxu0 %v2962_v24  ;;  %v3001_v7 = vld [vmem:[#allocation5 + $0x1b8] sm:$0xff]   ;;  %v111_v15 = vpack.c.bf16 %v87_v13, %v87_v13  ;;  %v3003_v17 = vld [vmem:[#allocation5 + $0x2c0] sm:$0xff]   ;;  %v3006_v20 = vld [vmem:[#allocation5 + $0x248] sm:$0xff]  }
  0x62   :  { %2641 = vmatprep.subr.bf16.mxu1 %v2963_v25  ;;  %v88_v9 = vld [vmem:[#allocation2 + $0x38] sm:$0xff]  ;;  %v3004_v18 = vld [vmem:[#allocation5 + $0x200] sm:$0xff]   ;;  %v3007_v21 = vld [vmem:[#allocation5 + $0x2c8] sm:$0xff]  }
  0x63   :  { %v112_v11 = vpack.c.bf16 %v88_v9, %v88_v9  ;;  %v3005_v19 = vld [vmem:[#allocation5 + $0x280] sm:$0xff]   ;;  %v3008_v22 = vld [vmem:[#allocation5 + $0x208] sm:$0xff]   ;;  %v3010_v24 = vld [vmem:[#allocation5 + $0x250] sm:$0xff]  }
  0x64   :  { %2620 = vmatpush3.bf16.msra.mxu0 %v2964_v26  ;;  %v3009_v23 = vld [vmem:[#allocation5 + $0x288] sm:$0xff]   ;;  %v3011_v25 = vld [vmem:[#allocation5 + $0x2d0] sm:$0xff]   ;;  %v3018_v32 = vld [vmem:[#allocation5 + $0x260] sm:$0xff]  }
  0x65   :  { %2642 = vmatpush3.bf16.msra.mxu1 %v2965_v27  ;;  %2621 = vmatprep.subr.bf16.mxu0 %v2966_v28  ;;  %v3012_v26 = vld [vmem:[#allocation5 + $0x210] sm:$0xff]   ;;  %v3014_v28 = vld [vmem:[#allocation5 + $0x258] sm:$0xff]   ;;  %v3019_v33 = vld [vmem:[#allocation5 + $0x2e0] sm:$0xff]  }
  0x66   :  { %2643 = vmatprep.subr.bf16.mxu1 %v2967_v29  ;;  %v3013_v27 = vld [vmem:[#allocation5 + $0x290] sm:$0xff]   ;;  %v3015_v29 = vld [vmem:[#allocation5 + $0x2d8] sm:$0xff]   ;;  %v3020_v34 = vld [vmem:[#allocation5 + $0x220] sm:$0xff]  }
  0x67   :  { %v3021_v35 = vld [vmem:[#allocation5 + $0x2a0] sm:$0xff]   ;;  %v3022_v36 = vld [vmem:[#allocation5 + $0x268] sm:$0xff]  }
  0x68   :  { %2622 = vmatpush3.bf16.msra.mxu0 %v2968_v30  ;;  %v3016_v30 = vld [vmem:[#allocation5 + $0x218] sm:$0xff]   ;;  %v3024_v38 = vld [vmem:[#allocation5 + $0x228] sm:$0xff]   ;;  %v3050_v8 = vld [vmem:[#allocation5 + $0x360] sm:$0xff]  }
  0x69   :  { %2644 = vmatpush3.bf16.msra.mxu1 %v2969_v31  ;;  %2651 = vmatprep.subr.bf16.mxu0 %v2970_v40  ;;  %v3017_v31 = vld [vmem:[#allocation5 + $0x298] sm:$0xff]   ;;  %v3026_v40 = vld [vmem:[#allocation5 + $0x270] sm:$0xff]   ;;  %v3051_v9 = vld [vmem:[#allocation5 + $0x3e0] sm:$0xff]  }
  0x6a   :  { %2673 = vmatprep.subr.bf16.mxu1 %v2971_v41  ;;  %v3027_v41 = vld [vmem:[#allocation5 + $0x2f0] sm:$0xff]   ;;  %v3054_v12 = vld [vmem:[#allocation5 + $0x368] sm:$0xff]  }
  0x6b   :  { %1705 = vmatmul.mubr.bf16.vlgmr.msra.gmra.mrb[0].mxu0 %v105_v37  ;;  %v3023_v37 = vld [vmem:[#allocation5 + $0x2e8] sm:$0xff]  }
  0x6c   :  { %1745 = vmatmul.mubr.bf16.vlgmr.msra.gmra.mrb[0].mxu1 %v107_v39  ;;  %2652 = vmatpush3.bf16.msra.mxu0 %v2972_v42  ;;  %v3025_v39 = vld [vmem:[#allocation5 + $0x2a8] sm:$0xff]   ;;  %v3028_v42 = vld [vmem:[#allocation5 + $0x230] sm:$0xff]  }
  0x6d   :  { %2674 = vmatpush3.bf16.msra.mxu1 %v2973_v43  ;;  %2653 = vmatprep.subr.bf16.mxu0 %v2974_v44  ;;  %v3029_v43 = vld [vmem:[#allocation5 + $0x2b0] sm:$0xff]   ;;  %v3030_v44 = vld [vmem:[#allocation5 + $0x278] sm:$0xff]   ;;  %v3055_v13 = vld [vmem:[#allocation5 + $0x3e8] sm:$0xff]  }
  0x6e   :  { %2675 = vmatprep.subr.bf16.mxu1 %v2975_v45  ;;  %1784 = vmatprep.mubr.bf16.mxu0 %v110_v10  ;;  %v3031_v45 = vld [vmem:[#allocation5 + $0x2f8] sm:$0xff]   ;;  %v3052_v10 = vld [vmem:[#allocation5 + $0x320] sm:$0xff]  }
  0x6f   :  { %1824 = vmatprep.mubr.bf16.mxu1 %v112_v11  ;;  %v3053_v11 = vld [vmem:[#allocation5 + $0x3a0] sm:$0xff]  }
  0x70   :  { %2654 = vmatpush3.bf16.msra.mxu0 %v2976_v46  ;;  %v3032_v46 = vld [vmem:[#allocation5 + $0x238] sm:$0xff]  }
  0x71   :  { %2676 = vmatpush3.bf16.msra.mxu1 %v2977_v47  ;;  %2655 = vmatprep.subr.bf16.mxu0 %v2978_v48  ;;  %v3033_v47 = vld [vmem:[#allocation5 + $0x2b8] sm:$0xff]   ;;  %v90_v48 = vld [vmem:[#allocation2 + $0x48] sm:$0xff] }
  0x72   :  { %2677 = vmatprep.subr.bf16.mxu1 %v2979_v49  ;;  %v114_v49 = vpack.c.bf16 %v90_v48, %v90_v48  ;;  %v3082_v48 = vld [vmem:[#allocation5 + $0x460] sm:$0xff]  }
  0x74   :  { %2656 = vmatpush3.bf16.msra.mxu0 %v2980_v50  ;;  %v92_v50 = vld [vmem:[#allocation2 + $0x58] sm:$0xff] }
  0x75   :  { %2678 = vmatpush3.bf16.msra.mxu1 %v2981_v51  ;;  %2657 = vmatprep.subr.bf16.mxu0 %v2982_v52  ;;  %v89_v51 = vld [vmem:[#allocation2 + $0x40] sm:$0xff]  ;;  %v91_v52 = vld [vmem:[#allocation2 + $0x50] sm:$0xff] }
  0x76   :  { %2679 = vmatprep.subr.bf16.mxu1 %v2983_v53  ;;  %v116_v53 = vpack.c.bf16 %v92_v50, %v92_v50  ;;  %v3084_v50 = vld [vmem:[#allocation5 + $0x420] sm:$0xff]  }
  0x78   :  { %2658 = vmatpush3.bf16.msra.mxu0 %v2984_v54  ;;  %v113_v54 = vpack.c.bf16 %v89_v51, %v89_v51  ;;  %v3085_v51 = vld [vmem:[#allocation5 + $0x4a0] sm:$0xff]  }
  0x79   :  { %2680 = vmatpush3.bf16.msra.mxu1 %v2985_v55  ;;  %2659 = vmatprep.subr.bf16.mxu0 %v2986_v56  ;;  %v115_v55 = vpack.c.bf16 %v91_v52, %v91_v52  ;;  %v3034_v56 = vld [vmem:[#allocation5 + $0x340] sm:$0xff]   ;;  %v3086_v52 = vld [vmem:[#allocation5 + $0x468] sm:$0xff]  }
  0x7a   :  { %2681 = vmatprep.subr.bf16.mxu1 %v2987_v57  ;;  %v3035_v57 = vld [vmem:[#allocation5 + $0x3c0] sm:$0xff]  }
  0x7c   :  { %2660 = vmatpush3.bf16.msra.mxu0 %v2988_v58  ;;  %v3036_v58 = vld [vmem:[#allocation5 + $0x300] sm:$0xff]  }
  0x7d   :  { %2682 = vmatpush3.bf16.msra.mxu1 %v2989_v59  ;;  %2661 = vmatprep.subr.bf16.mxu0 %v2990_v60  ;;  %v3037_v59 = vld [vmem:[#allocation5 + $0x380] sm:$0xff]   ;;  %v3038_v60 = vld [vmem:[#allocation5 + $0x348] sm:$0xff]  }
  0x7e   :  { %2683 = vmatprep.subr.bf16.mxu1 %v2991_v61  ;;  %v3039_v61 = vld [vmem:[#allocation5 + $0x3c8] sm:$0xff]  }
  0x80   :  { %2662 = vmatpush3.bf16.msra.mxu0 %v2992_v62  ;;  %v3040_v62 = vld [vmem:[#allocation5 + $0x308] sm:$0xff]  }
  0x81   :  { %2684 = vmatpush3.bf16.msra.mxu1 %v2993_v63  ;;  %2663 = vmatprep.subr.bf16.mxu0 %v2994_v0  ;;  %v3041_v63 = vld [vmem:[#allocation5 + $0x388] sm:$0xff]   ;;  %v3042_v0 = vld [vmem:[#allocation5 + $0x350] sm:$0xff]  }
  0x82   :  { %2685 = vmatprep.subr.bf16.mxu1 %v2995_v1  ;;  %v3043_v1 = vld [vmem:[#allocation5 + $0x3d0] sm:$0xff]  }
  0x84   :  { %2664 = vmatpush3.bf16.msra.mxu0 %v2996_v2  ;;  %v3044_v2 = vld [vmem:[#allocation5 + $0x310] sm:$0xff]  }
  0x85   :  { %2686 = vmatpush3.bf16.msra.mxu1 %v2997_v3  ;;  %2665 = vmatprep.subr.bf16.mxu0 %v2998_v4  ;;  %v3045_v3 = vld [vmem:[#allocation5 + $0x390] sm:$0xff]   ;;  %v3046_v4 = vld [vmem:[#allocation5 + $0x358] sm:$0xff]  }
  0x86   :  { %2687 = vmatprep.subr.bf16.mxu1 %v2999_v5  ;;  %v3047_v5 = vld [vmem:[#allocation5 + $0x3d8] sm:$0xff]  }
  0x88   :  { %2666 = vmatpush3.bf16.msra.mxu0 %v3000_v6  ;;  %v3048_v6 = vld [vmem:[#allocation5 + $0x318] sm:$0xff]  }
  0x89   :  { %2688 = vmatpush3.bf16.msra.mxu1 %v3001_v7  ;;  %2695 = vmatprep.subr.bf16.mxu0 %v3002_v16  ;;  %v3049_v7 = vld [vmem:[#allocation5 + $0x398] sm:$0xff]   ;;  %v3058_v16 = vld [vmem:[#allocation5 + $0x370] sm:$0xff]  }
  0x8a   :  { %2717 = vmatprep.subr.bf16.mxu1 %v3003_v17  ;;  %v3059_v17 = vld [vmem:[#allocation5 + $0x3f0] sm:$0xff]  }
  0x8b   :  { %1785 = vmatmul.mubr.bf16.vlgmr.msra.gmra.mrb[4].mxu0 %v109_v14  ;;  %v3056_v14 = vld [vmem:[#allocation5 + $0x328] sm:$0xff]  }
  0x8c   :  { %1825 = vmatmul.mubr.bf16.vlgmr.msra.gmra.mrb[4].mxu1 %v111_v15  ;;  %2696 = vmatpush3.bf16.msra.mxu0 %v3004_v18  ;;  %v3057_v15 = vld [vmem:[#allocation5 + $0x3a8] sm:$0xff]   ;;  %v3060_v18 = vld [vmem:[#allocation5 + $0x330] sm:$0xff]  }
  0x8d   :  { %2718 = vmatpush3.bf16.msra.mxu1 %v3005_v19  ;;  %2697 = vmatprep.subr.bf16.mxu0 %v3006_v20  ;;  %v3061_v19 = vld [vmem:[#allocation5 + $0x3b0] sm:$0xff]   ;;  %v3062_v20 = vld [vmem:[#allocation5 + $0x378] sm:$0xff]  }
  0x8e   :  { %2719 = vmatprep.subr.bf16.mxu1 %v3007_v21  ;;  %1864 = vmatprep.mubr.bf16.mxu0 %v114_v49  ;;  %v3063_v21 = vld [vmem:[#allocation5 + $0x3f8] sm:$0xff]   ;;  %v3083_v49 = vld [vmem:[#allocation5 + $0x4e0] sm:$0xff]  }
  0x8f   :  { %1904 = vmatprep.mubr.bf16.mxu1 %v116_v53  ;;  %v3087_v53 = vld [vmem:[#allocation5 + $0x4e8] sm:$0xff]  }
  0x90   :  { %2698 = vmatpush3.bf16.msra.mxu0 %v3008_v22  ;;  %v3064_v22 = vld [vmem:[#allocation5 + $0x338] sm:$0xff]  }
  0x91   :  { %2720 = vmatpush3.bf16.msra.mxu1 %v3009_v23  ;;  %2699 = vmatprep.subr.bf16.mxu0 %v3010_v24  ;;  %v3065_v23 = vld [vmem:[#allocation5 + $0x3b8] sm:$0xff]   ;;  %v94_v24 = vld [vmem:[#allocation2 + $0x68] sm:$0xff] }
  0x92   :  { %2721 = vmatprep.subr.bf16.mxu1 %v3011_v25  ;;  %v96_v25 = vld [vmem:[#allocation2 + $0x78] sm:$0xff] }
  0x94   :  { %2700 = vmatpush3.bf16.msra.mxu0 %v3012_v26  ;;  %v93_v26 = vld [vmem:[#allocation2 + $0x60] sm:$0xff] }
  0x95   :  { %2722 = vmatpush3.bf16.msra.mxu1 %v3013_v27  ;;  %2701 = vmatprep.subr.bf16.mxu0 %v3014_v28  ;;  %v118_v27 = vpack.c.bf16 %v94_v24, %v94_v24  ;;  %v120_v28 = vpack.c.bf16 %v96_v25, %v96_v25  ;;  %v3114_v24 = vld [vmem:[#allocation5 + $0x560] sm:$0xff]  }
  0x96   :  { %2723 = vmatprep.subr.bf16.mxu1 %v3015_v29  ;;  %v117_v29 = vpack.c.bf16 %v93_v26, %v93_v26  ;;  %v3115_v25 = vld [vmem:[#allocation5 + $0x5e0] sm:$0xff]  }
  0x97   :  { %v3116_v26 = vld [vmem:[#allocation5 + $0x520] sm:$0xff]  }
  0x98   :  { %2702 = vmatpush3.bf16.msra.mxu0 %v3016_v30  ;;  %v95_v30 = vld [vmem:[#allocation2 + $0x70] sm:$0xff] }
  0x99   :  { %2724 = vmatpush3.bf16.msra.mxu1 %v3017_v31  ;;  %2703 = vmatprep.subr.bf16.mxu0 %v3018_v32  ;;  %v119_v31 = vpack.c.bf16 %v95_v30, %v95_v30  ;;  %v3066_v32 = vld [vmem:[#allocation5 + $0x440] sm:$0xff]   ;;  %v3120_v30 = vld [vmem:[#allocation5 + $0x528] sm:$0xff]  }
  0x9a   :  { %2725 = vmatprep.subr.bf16.mxu1 %v3019_v33  ;;  %v3067_v33 = vld [vmem:[#allocation5 + $0x4c0] sm:$0xff]  }
  0x9c   :  { %2704 = vmatpush3.bf16.msra.mxu0 %v3020_v34  ;;  %v3068_v34 = vld [vmem:[#allocation5 + $0x400] sm:$0xff]  }
  0x9d   :  { %2726 = vmatpush3.bf16.msra.mxu1 %v3021_v35  ;;  %2705 = vmatprep.subr.bf16.mxu0 %v3022_v36  ;;  %v3069_v35 = vld [vmem:[#allocation5 + $0x480] sm:$0xff]   ;;  %v3070_v36 = vld [vmem:[#allocation5 + $0x448] sm:$0xff]  }
  0x9e   :  { %2727 = vmatprep.subr.bf16.mxu1 %v3023_v37  ;;  %v3071_v37 = vld [vmem:[#allocation5 + $0x4c8] sm:$0xff]  }
  0xa0   :  { %2706 = vmatpush3.bf16.msra.mxu0 %v3024_v38  ;;  %v3072_v38 = vld [vmem:[#allocation5 + $0x408] sm:$0xff]  }
  0xa1   :  { %2728 = vmatpush3.bf16.msra.mxu1 %v3025_v39  ;;  %2707 = vmatprep.subr.bf16.mxu0 %v3026_v40  ;;  %v3073_v39 = vld [vmem:[#allocation5 + $0x488] sm:$0xff]   ;;  %v3074_v40 = vld [vmem:[#allocation5 + $0x450] sm:$0xff]  }
  0xa2   :  { %2729 = vmatprep.subr.bf16.mxu1 %v3027_v41  ;;  %v3075_v41 = vld [vmem:[#allocation5 + $0x4d0] sm:$0xff]  }
  0xa4   :  { %2708 = vmatpush3.bf16.msra.mxu0 %v3028_v42  ;;  %v3076_v42 = vld [vmem:[#allocation5 + $0x410] sm:$0xff]  }
  0xa5   :  { %2730 = vmatpush3.bf16.msra.mxu1 %v3029_v43  ;;  %2709 = vmatprep.subr.bf16.mxu0 %v3030_v44  ;;  %v3077_v43 = vld [vmem:[#allocation5 + $0x490] sm:$0xff]   ;;  %v3078_v44 = vld [vmem:[#allocation5 + $0x458] sm:$0xff]  }
  0xa6   :  { %2731 = vmatprep.subr.bf16.mxu1 %v3031_v45  ;;  %v3079_v45 = vld [vmem:[#allocation5 + $0x4d8] sm:$0xff]  }
  0xa8   :  { %2710 = vmatpush3.bf16.msra.mxu0 %v3032_v46  ;;  %v3080_v46 = vld [vmem:[#allocation5 + $0x418] sm:$0xff]  }
  0xa9   :  { %2732 = vmatpush3.bf16.msra.mxu1 %v3033_v47  ;;  %2739 = vmatprep.subr.bf16.mxu0 %v3034_v56  ;;  %v3081_v47 = vld [vmem:[#allocation5 + $0x498] sm:$0xff]   ;;  %v3090_v56 = vld [vmem:[#allocation5 + $0x470] sm:$0xff]  }
  0xaa   :  { %2761 = vmatprep.subr.bf16.mxu1 %v3035_v57  ;;  %v3091_v57 = vld [vmem:[#allocation5 + $0x4f0] sm:$0xff]  }
  0xab   :  { %1865 = vmatmul.mubr.bf16.vlgmr.msra.gmra.mrb[8].mxu0 %v113_v54  ;;  %v3088_v54 = vld [vmem:[#allocation5 + $0x428] sm:$0xff]  }
  0xac   :  { %1905 = vmatmul.mubr.bf16.vlgmr.msra.gmra.mrb[8].mxu1 %v115_v55  ;;  %2740 = vmatpush3.bf16.msra.mxu0 %v3036_v58  ;;  %v3089_v55 = vld [vmem:[#allocation5 + $0x4a8] sm:$0xff]   ;;  %v3092_v58 = vld [vmem:[#allocation5 + $0x430] sm:$0xff]  }
  0xad   :  { %2762 = vmatpush3.bf16.msra.mxu1 %v3037_v59  ;;  %2741 = vmatprep.subr.bf16.mxu0 %v3038_v60  ;;  %v3093_v59 = vld [vmem:[#allocation5 + $0x4b0] sm:$0xff]   ;;  %v3094_v60 = vld [vmem:[#allocation5 + $0x478] sm:$0xff]  }
  0xae   :  { %2763 = vmatprep.subr.bf16.mxu1 %v3039_v61  ;;  %1944 = vmatprep.mubr.bf16.mxu0 %v118_v27  ;;  %v3095_v61 = vld [vmem:[#allocation5 + $0x4f8] sm:$0xff]   ;;  %v3117_v27 = vld [vmem:[#allocation5 + $0x5a0] sm:$0xff]  }
  0xaf   :  { %1984 = vmatprep.mubr.bf16.mxu1 %v120_v28  ;;  %v3118_v28 = vld [vmem:[#allocation5 + $0x568] sm:$0xff]  }
  0xb0   :  { %2742 = vmatpush3.bf16.msra.mxu0 %v3040_v62  ;;  %v3096_v62 = vld [vmem:[#allocation5 + $0x438] sm:$0xff]  }
  0xb1   :  { %2764 = vmatpush3.bf16.msra.mxu1 %v3041_v63  ;;  %2743 = vmatprep.subr.bf16.mxu0 %v3042_v0  ;;  %v3097_v63 = vld [vmem:[#allocation5 + $0x4b8] sm:$0xff]   ;;  %v98_v0 = vld [vmem:[#allocation2 + $0x88] sm:$0xff] }
  0xb2   :  { %2765 = vmatprep.subr.bf16.mxu1 %v3043_v1  ;;  %v100_v1 = vld [vmem:[#allocation2 + $0x98] sm:$0xff] }
  0xb4   :  { %2744 = vmatpush3.bf16.msra.mxu0 %v3044_v2  ;;  %v122_v2 = vpack.c.bf16 %v98_v0, %v98_v0  ;;  %v3132_v0 = vld [vmem:[#allocation7 + $0x10] sm:$0xff]  }
  0xb5   :  { %2766 = vmatpush3.bf16.msra.mxu1 %v3045_v3  ;;  %2745 = vmatprep.subr.bf16.mxu0 %v3046_v4  ;;  %v124_v3 = vpack.c.bf16 %v100_v1, %v100_v1  ;;  %v97_v4 = vld [vmem:[#allocation2 + $0x80] sm:$0xff]  ;;  %v3133_v1 = vld [vmem:[#allocation7 + $0x18] sm:$0xff]  }
  0xb6   :  { %2767 = vmatprep.subr.bf16.mxu1 %v3047_v5  ;;  %v99_v5 = vld [vmem:[#allocation2 + $0x90] sm:$0xff] }
  0xb8   :  { %2746 = vmatpush3.bf16.msra.mxu0 %v3048_v6  ;;  %v121_v6 = vpack.c.bf16 %v97_v4, %v97_v4 }
  0xb9   :  { %2768 = vmatpush3.bf16.msra.mxu1 %v3049_v7  ;;  %2747 = vmatprep.subr.bf16.mxu0 %v3050_v8  ;;  %v123_v7 = vpack.c.bf16 %v99_v5, %v99_v5  ;;  %v3098_v8 = vld [vmem:[#allocation5 + $0x540] sm:$0xff]  }
  0xba   :  { %2769 = vmatprep.subr.bf16.mxu1 %v3051_v9  ;;  %v3099_v9 = vld [vmem:[#allocation5 + $0x5c0] sm:$0xff]  }
  0xbc   :  { %2748 = vmatpush3.bf16.msra.mxu0 %v3052_v10  ;;  %v3100_v10 = vld [vmem:[#allocation5 + $0x500] sm:$0xff]  }
  0xbd   :  { %2770 = vmatpush3.bf16.msra.mxu1 %v3053_v11  ;;  %2749 = vmatprep.subr.bf16.mxu0 %v3054_v12  ;;  %v3101_v11 = vld [vmem:[#allocation5 + $0x580] sm:$0xff]   ;;  %v3102_v12 = vld [vmem:[#allocation5 + $0x548] sm:$0xff]  }
  0xbe   :  { %2771 = vmatprep.subr.bf16.mxu1 %v3055_v13  ;;  %v3103_v13 = vld [vmem:[#allocation5 + $0x5c8] sm:$0xff]  }
  0xc0   :  { %2750 = vmatpush3.bf16.msra.mxu0 %v3056_v14  ;;  %v3104_v14 = vld [vmem:[#allocation5 + $0x508] sm:$0xff]  }
  0xc1   :  { %2772 = vmatpush3.bf16.msra.mxu1 %v3057_v15  ;;  %2751 = vmatprep.subr.bf16.mxu0 %v3058_v16  ;;  %v3105_v15 = vld [vmem:[#allocation5 + $0x588] sm:$0xff]   ;;  %v3106_v16 = vld [vmem:[#allocation5 + $0x550] sm:$0xff]  }
  0xc2   :  { %2773 = vmatprep.subr.bf16.mxu1 %v3059_v17  ;;  %v3107_v17 = vld [vmem:[#allocation5 + $0x5d0] sm:$0xff]  }
  0xc4   :  { %2752 = vmatpush3.bf16.msra.mxu0 %v3060_v18  ;;  %v3108_v18 = vld [vmem:[#allocation5 + $0x510] sm:$0xff]  }
  0xc5   :  { %2774 = vmatpush3.bf16.msra.mxu1 %v3061_v19  ;;  %2753 = vmatprep.subr.bf16.mxu0 %v3062_v20  ;;  %v3109_v19 = vld [vmem:[#allocation5 + $0x590] sm:$0xff]   ;;  %v3110_v20 = vld [vmem:[#allocation5 + $0x558] sm:$0xff]  }
  0xc6   :  { %2775 = vmatprep.subr.bf16.mxu1 %v3063_v21  ;;  %v3111_v21 = vld [vmem:[#allocation5 + $0x5d8] sm:$0xff]  }
  0xc8   :  { %2754 = vmatpush3.bf16.msra.mxu0 %v3064_v22  ;;  %v3112_v22 = vld [vmem:[#allocation5 + $0x518] sm:$0xff]  }
  0xc9   :  { %2776 = vmatpush3.bf16.msra.mxu1 %v3065_v23  ;;  %2783 = vmatprep.subr.bf16.mxu0 %v3066_v32  ;;  %v3113_v23 = vld [vmem:[#allocation5 + $0x598] sm:$0xff]   ;;  %v3122_v32 = vld [vmem:[#allocation5 + $0x570] sm:$0xff]  }
  0xca   :  { %2805 = vmatprep.subr.bf16.mxu1 %v3067_v33  ;;  %v3123_v33 = vld [vmem:[#allocation5 + $0x5f0] sm:$0xff]  }
  0xcb   :  { %1945 = vmatmul.mubr.bf16.vlgmr.msra.gmra.mrb[12].mxu0 %v117_v29  ;;  %v3119_v29 = vld [vmem:[#allocation5 + $0x5e8] sm:$0xff]  }
  0xcc   :  { %1985 = vmatmul.mubr.bf16.vlgmr.msra.gmra.mrb[12].mxu1 %v119_v31  ;;  %2784 = vmatpush3.bf16.msra.mxu0 %v3068_v34  ;;  %v3121_v31 = vld [vmem:[#allocation5 + $0x5a8] sm:$0xff]   ;;  %v3124_v34 = vld [vmem:[#allocation5 + $0x530] sm:$0xff]  }
  0xcd   :  { %2806 = vmatpush3.bf16.msra.mxu1 %v3069_v35  ;;  %2785 = vmatprep.subr.bf16.mxu0 %v3070_v36  ;;  %v3125_v35 = vld [vmem:[#allocation5 + $0x5b0] sm:$0xff]   ;;  %v3126_v36 = vld [vmem:[#allocation5 + $0x578] sm:$0xff]  }
  0xce   :  { %2807 = vmatprep.subr.bf16.mxu1 %v3071_v37  ;;  %2024 = vmatprep.mubr.bf16.mxu0 %v122_v2  ;;  %v3127_v37 = vld [vmem:[#allocation5 + $0x5f8] sm:$0xff]   ;;  %v3134_v2 = vld [vmem:[#allocation7 + $0x20] sm:$0xff]  }
  0xcf   :  { %2064 = vmatprep.mubr.bf16.mxu1 %v124_v3 }
  0xd0   :  { %2786 = vmatpush3.bf16.msra.mxu0 %v3072_v38  ;;  %v3128_v38 = vld [vmem:[#allocation5 + $0x538] sm:$0xff]  }
  0xd1   :  { %2808 = vmatpush3.bf16.msra.mxu1 %v3073_v39  ;;  %2787 = vmatprep.subr.bf16.mxu0 %v3074_v40  ;;  %v3129_v39 = vld [vmem:[#allocation5 + $0x5b8] sm:$0xff]   ;;  %v102_v40 = vld [vmem:[#allocation2 + $0xa8] sm:$0xff] }
  0xd2   :  { %2809 = vmatprep.subr.bf16.mxu1 %v3075_v41  ;;  %v126_v41 = vpack.c.bf16 %v102_v40, %v102_v40 }
  0xd4   :  { %2788 = vmatpush3.bf16.msra.mxu0 %v3076_v42  ;;  %v104_v42 = vld [vmem:[#allocation2 + $0xb8] sm:$0xff] }
  0xd5   :  { %2810 = vmatpush3.bf16.msra.mxu1 %v3077_v43  ;;  %2789 = vmatprep.subr.bf16.mxu0 %v3078_v44  ;;  %v101_v43 = vld [vmem:[#allocation2 + $0xa0] sm:$0xff]  ;;  %v103_v44 = vld [vmem:[#allocation2 + $0xb0] sm:$0xff] }
  0xd6   :  { %2811 = vmatprep.subr.bf16.mxu1 %v3079_v45  ;;  %v128_v45 = vpack.c.bf16 %v104_v42, %v104_v42 }
  0xd8   :  { %2790 = vmatpush3.bf16.msra.mxu0 %v3080_v46  ;;  %v125_v46 = vpack.c.bf16 %v101_v43, %v101_v43 }
  0xd9   :  { %2812 = vmatpush3.bf16.msra.mxu1 %v3081_v47  ;;  %2791 = vmatprep.subr.bf16.mxu0 %v3082_v48  ;;  %v127_v47 = vpack.c.bf16 %v103_v44, %v103_v44 }
  0xda   :  { %2813 = vmatprep.subr.bf16.mxu1 %v3083_v49 }
  0xdc   :  { %2792 = vmatpush3.bf16.msra.mxu0 %v3084_v50  ;;  %v2396_v50 = vld [vmem:[%s3411_s2] ss:$0 sm:$0xff] }
  0xdd   :  { %2814 = vmatpush3.bf16.msra.mxu1 %v3085_v51  ;;  %2793 = vmatprep.subr.bf16.mxu0 %v3086_v52 }
  0xde   :  { %2815 = vmatprep.subr.bf16.mxu1 %v3087_v53 }
  0xe0   :  { %2794 = vmatpush3.bf16.msra.mxu0 %v3088_v54 }
  0xe1   :  { %2816 = vmatpush3.bf16.msra.mxu1 %v3089_v55  ;;  %2795 = vmatprep.subr.bf16.mxu0 %v3090_v56 }
  0xe2   :  { %2817 = vmatprep.subr.bf16.mxu1 %v3091_v57 }
  0xe4   :  { %2796 = vmatpush3.bf16.msra.mxu0 %v3092_v58 }
  0xe5   :  { %2818 = vmatpush3.bf16.msra.mxu1 %v3093_v59  ;;  %2797 = vmatprep.subr.bf16.mxu0 %v3094_v60 }
  0xe6   :  { %2819 = vmatprep.subr.bf16.mxu1 %v3095_v61  ;;  %v3130_v61 = vld [vmem:[#allocation7] sm:$0xff]  }
  0xe8   :  { %2798 = vmatpush3.bf16.msra.mxu0 %v3096_v62  ;;  %v3270_v62 = vmov 0.0  }
  0xe9   :  { %2820 = vmatpush3.bf16.msra.mxu1 %v3097_v63  ;;  %2827 = vmatprep.subr.bf16.mxu0 %v3098_v8  ;;  %v3131_v63 = vld [vmem:[#allocation7 + $0x8] sm:$0xff]  }
  0xea   :  { %2849 = vmatprep.subr.bf16.mxu1 %v3099_v9 }
  0xeb   :  { %2025 = vmatmul.mubr.bf16.vlgmr.msra.gmra.mrb[16].mxu0 %v121_v6 }
  0xec   :  { %2065 = vmatmul.mubr.bf16.vlgmr.msra.gmra.mrb[16].mxu1 %v123_v7  ;;  %2828 = vmatpush3.bf16.msra.mxu0 %v3100_v10 }
  0xed   :  { %2850 = vmatpush3.bf16.msra.mxu1 %v3101_v11  ;;  %2829 = vmatprep.subr.bf16.mxu0 %v3102_v12 }
  0xee   :  { %2851 = vmatprep.subr.bf16.mxu1 %v3103_v13  ;;  %2104 = vmatprep.mubr.bf16.mxu0 %v126_v41 }
  0xef   :  { %2144 = vmatprep.mubr.bf16.mxu1 %v128_v45 }
  0xf0   :  { %2830 = vmatpush3.bf16.msra.mxu0 %v3104_v14  ;;  %v3135_v14 = vld [vmem:[#allocation7 + $0x28] sm:$0xff]  }
  0xf1   :  { %2852 = vmatpush3.bf16.msra.mxu1 %v3105_v15  ;;  %2831 = vmatprep.subr.bf16.mxu0 %v3106_v16  ;;  %v3136_v16 = vld [vmem:[#allocation7 + $0x30] sm:$0xff]  }
  0xf2   :  { %2853 = vmatprep.subr.bf16.mxu1 %v3107_v17  ;;  %v3137_v17 = vld [vmem:[#allocation7 + $0x38] sm:$0xff]  }
  0xf4   :  { %2832 = vmatpush3.bf16.msra.mxu0 %v3108_v18  ;;  %v3138_v18 = vld [vmem:[#allocation8] sm:$0xff]  }
  0xf5   :  { %2854 = vmatpush3.bf16.msra.mxu1 %v3109_v19  ;;  %2833 = vmatprep.subr.bf16.mxu0 %v3110_v20  ;;  %v3139_v19 = vld [vmem:[#allocation8 + $0x8] sm:$0xff]   ;;  %v3140_v20 = vld [vmem:[#allocation8 + $0x10] sm:$0xff]  }
  0xf6   :  { %2855 = vmatprep.subr.bf16.mxu1 %v3111_v21  ;;  %v3141_v21 = vld [vmem:[#allocation8 + $0x18] sm:$0xff]  }
  0xf8   :  { %2834 = vmatpush3.bf16.msra.mxu0 %v3112_v22  ;;  %v3142_v22 = vld [vmem:[#allocation8 + $0x20] sm:$0xff]  }
  0xf9   :  { %2856 = vmatpush3.bf16.msra.mxu1 %v3113_v23  ;;  %2835 = vmatprep.subr.bf16.mxu0 %v3114_v24 }
  0xfa   :  { %2857 = vmatprep.subr.bf16.mxu1 %v3115_v25 }
  0xfc   :  { %2836 = vmatpush3.bf16.msra.mxu0 %v3116_v26 }
  0xfd   :  { %2858 = vmatpush3.bf16.msra.mxu1 %v3117_v27  ;;  %2837 = vmatprep.subr.bf16.mxu0 %v3118_v28 }
  0xfe   :  { %2859 = vmatprep.subr.bf16.mxu1 %v3119_v29  ;;  %v3143_v29 = vld [vmem:[#allocation8 + $0x28] sm:$0xff]  }
 0x100   :  { %2838 = vmatpush3.bf16.msra.mxu0 %v3120_v30 }
 0x101   :  { %2860 = vmatpush3.bf16.msra.mxu1 %v3121_v31  ;;  %2839 = vmatprep.subr.bf16.mxu0 %v3122_v32 }
 0x102   :  { %2861 = vmatprep.subr.bf16.mxu1 %v3123_v33 }
 0x104   :  { %2840 = vmatpush3.bf16.msra.mxu0 %v3124_v34 }
 0x105   :  { %2862 = vmatpush3.bf16.msra.mxu1 %v3125_v35  ;;  %2841 = vmatprep.subr.bf16.mxu0 %v3126_v36 }
 0x106   :  { %2863 = vmatprep.subr.bf16.mxu1 %v3127_v37 }
 0x108   :  { %2842 = vmatpush3.bf16.msra.mxu0 %v3128_v38 }
 0x109   :  { %2864 = vmatpush3.bf16.msra.mxu1 %v3129_v39  ;;  %2889 = vmatprep.subr.bf16.mxu0 %v3270_v62 }
 0x10a   :  { %2909 = vmatprep.subr.bf16.mxu1 %v3270_v62 }
 0x10b   :  { %2105 = vmatmul.mubr.bf16.vlgmr.msra.gmra.mrb[20].mxu0 %v125_v46 }
 0x10c   :  { %2145 = vmatmul.mubr.bf16.vlgmr.msra.gmra.mrb[20].mxu1 %v127_v47  ;;  %2890 = vmatpush3.bf16.msra.mxu0 %v3130_v61 }
 0x10d   :  { %2891 = vmatprep.subr.bf16.mxu0 %v3270_v62  ;;  %2905 = vmatprep.mubr.msk.bf16.mxu0 %vm3271_vm0, %v3270_v62 }
 0x10e   :  { %2925 = vmatprep.mubr.msk.bf16.mxu1 %vm3271_vm0, %v3270_v62  ;;  %2910 = vmatpush3.bf16.msra.mxu1 %v3138_v18 }
 0x10f   :  { %2911 = vmatprep.subr.bf16.mxu1 %v3270_v62 }
 0x110   :  { %2892 = vmatpush3.bf16.msra.mxu0 %v3131_v63 }
 0x111   :  { %2893 = vmatprep.subr.bf16.mxu0 %v3270_v62 }
 0x112   :  { %2912 = vmatpush3.bf16.msra.mxu1 %v3139_v19 }
 0x113   :  { %2913 = vmatprep.subr.bf16.mxu1 %v3270_v62 }
 0x114   :  { %2894 = vmatpush3.bf16.msra.mxu0 %v3132_v0 }
 0x115   :  { %2895 = vmatprep.subr.bf16.mxu0 %v3270_v62 }
 0x116   :  { %2914 = vmatpush3.bf16.msra.mxu1 %v3140_v20 }
 0x117   :  { %2915 = vmatprep.subr.bf16.mxu1 %v3270_v62 }
 0x118   :  { %2896 = vmatpush3.bf16.msra.mxu0 %v3133_v1 }
 0x119   :  { %2897 = vmatprep.subr.bf16.mxu0 %v3270_v62 }
 0x11a   :  { %2916 = vmatpush3.bf16.msra.mxu1 %v3141_v21  ;;  %v2598_v21 = vld [vmem:[%s3415_s6] ss:$0 sm:$0xff] }
 0x11b   :  { %2917 = vmatprep.subr.bf16.mxu1 %v3270_v62 }
 0x11c   :  { %2898 = vmatpush3.bf16.msra.mxu0 %v3134_v2 }
 0x11d   :  { %2899 = vmatprep.subr.bf16.mxu0 %v3270_v62 }
 0x11e   :  { %2918 = vmatpush3.bf16.msra.mxu1 %v3142_v22 }
 0x11f   :  { %2919 = vmatprep.subr.bf16.mxu1 %v3270_v62 }
 0x120   :  { %2900 = vmatpush3.bf16.msra.mxu0 %v3135_v14 }
 0x121   :  { %2901 = vmatprep.subr.bf16.mxu0 %v3270_v62 }
 0x122   :  { %2920 = vmatpush3.bf16.msra.mxu1 %v3143_v29 }
 0x123   :  { %2921 = vmatprep.subr.bf16.mxu1 %v3270_v62 }
 0x124   :  { %2902 = vmatpush3.bf16.msra.mxu0 %v3136_v16 }
 0x125   :  { %2903 = vmatprep.subr.bf16.mxu0 %v3270_v62 }
 0x128   :  { %2904 = vmatpush3.bf16.msra.mxu0 %v3137_v17 }
 0x13e   :  { %v2623_v48 = vpop.f32.mrb[0].mxu0 }
 0x13f   :  { %v2645_v49 = vpop.f32.mrb[0].mxu1  ;;  %v2624_v51 = vpop.f32.mrb[1].mxu0 }
 0x140   :  { %v2646_v52 = vpop.f32.mrb[1].mxu1  ;;  %v2625_v53 = vadd.f32 %v2624_v51, %v2623_v48  ;;  %v2626_v55 = vpop.f32.mrb[2].mxu0 }
 0x141   :  { %v2647_v54 = vadd.f32 %v2646_v52, %v2645_v49  ;;  %v2648_v56 = vpop.f32.mrb[2].mxu1  ;;  %v2627_v57 = vpop.f32.mrb[3].mxu0 }
 0x142   :  { %v2649_v58 = vpop.f32.mrb[3].mxu1  ;;  %v1707_v59 = vadd.f32 %v2625_v53, %v2396_v50 }
 0x144   :  { %v1747_v60 = vadd.f32 %v2647_v54, %v1707_v59 }
 0x15e   :  { %v2667_v3 = vpop.f32.mrb[4].mxu0 }
 0x15f   :  { %v2689_v4 = vpop.f32.mrb[4].mxu1  ;;  %v2668_v5 = vpop.f32.mrb[5].mxu0 }
 0x160   :  { %v2669_v6 = vadd.f32 %v2668_v5, %v2667_v3  ;;  %v2690_v7 = vpop.f32.mrb[5].mxu1  ;;  %v2670_v8 = vpop.f32.mrb[6].mxu0 }
 0x161   :  { %v2691_v9 = vadd.f32 %v2690_v7, %v2689_v4  ;;  %v2692_v10 = vpop.f32.mrb[6].mxu1  ;;  %v2671_v11 = vpop.f32.mrb[7].mxu0 }
 0x162   :  { %v1787_v12 = vadd.f32 %v2669_v6, %v1747_v60  ;;  %v2693_v13 = vpop.f32.mrb[7].mxu1  ;;  %v3144_v11 = vld [vmem:[#allocation8 + $0x30] sm:$0xff]  }
 0x163   :  { %2922 = vmatpush3.bf16.msra.mxu1 %v3144_v11  ;;  %v2589_v13 = vld [vmem:[%s3413_s4] ss:$0 sm:$0xff]  ;;  %s3234_s4 = scalar_lea.vmem %s2386_s29, 128 }
 0x164   :  { %v1827_v15 = vadd.f32 %v2691_v9, %v1787_v12  ;;  %2923 = vmatprep.subr.bf16.mxu1 %v3270_v62  ;;  %v3145_v12 = vld [vmem:[#allocation8 + $0x38] sm:$0xff]   ;;  %p3235_p4 = scmp.ne.s32.totalorder %s2386_s29, %s3234_s4  ;;  %p3240_p6 = scmp.lt.s32.totalorder %s3234_s4, %s3234_s4 }
 0x166   :  { %p3241_p7 = por %p3240_p6, %p3239_p5 }
 0x167   :  { %2924 = vmatpush3.bf16.msra.mxu1 %v3145_v12 }
 0x168   :  { %p3242_p8 = pnand %p3241_p7, %p3235_p4 }
 0x17e   :  { %v2711_v23 = vpop.f32.mrb[8].mxu0 }
 0x17f   :  { %v2733_v24 = vpop.f32.mrb[8].mxu1  ;;  %v2712_v25 = vpop.f32.mrb[9].mxu0 }
 0x180   :  { %v2713_v26 = vadd.f32 %v2712_v25, %v2711_v23  ;;  %v2734_v27 = vpop.f32.mrb[9].mxu1  ;;  %v2714_v28 = vpop.f32.mrb[10].mxu0 }
 0x181   :  { %v2735_v30 = vadd.f32 %v2734_v27, %v2733_v24  ;;  %v2736_v31 = vpop.f32.mrb[10].mxu1  ;;  %v2715_v32 = vpop.f32.mrb[11].mxu0 }
 0x182   :  { %v1867_v33 = vadd.f32 %v2713_v26, %v1827_v15  ;;  %v2737_v34 = vpop.f32.mrb[11].mxu1 }
 0x184   :  { %v1907_v35 = vadd.f32 %v2735_v30, %v1867_v33 }
 0x19e   :  { %v2755_v36 = vpop.f32.mrb[12].mxu0 }
 0x19f   :  { %v2777_v37 = vpop.f32.mrb[12].mxu1  ;;  %v2756_v38 = vpop.f32.mrb[13].mxu0 }
 0x1a0   :  { %v2778_v39 = vpop.f32.mrb[13].mxu1  ;;  %v2757_v40 = vadd.f32 %v2756_v38, %v2755_v36  ;;  %v2758_v42 = vpop.f32.mrb[14].mxu0 }
 0x1a1   :  { %v2779_v41 = vadd.f32 %v2778_v39, %v2777_v37  ;;  %v2780_v43 = vpop.f32.mrb[14].mxu1  ;;  %v2759_v44 = vpop.f32.mrb[15].mxu0 }
 0x1a2   :  { %v2781_v45 = vpop.f32.mrb[15].mxu1  ;;  %v1947_v46 = vadd.f32 %v2757_v40, %v1907_v35 }
 0x1a4   :  { %v1987_v47 = vadd.f32 %v2779_v41, %v1947_v46 }
 0x1be   :  { %v2799_v48 = vpop.f32.mrb[16].mxu0 }
 0x1bf   :  { %v2821_v49 = vpop.f32.mrb[16].mxu1  ;;  %v2800_v50 = vpop.f32.mrb[17].mxu0 }
 0x1c0   :  { %v2801_v51 = vadd.f32 %v2800_v50, %v2799_v48  ;;  %v2822_v52 = vpop.f32.mrb[17].mxu1  ;;  %v2802_v53 = vpop.f32.mrb[18].mxu0 }
 0x1c1   :  { %v2823_v54 = vadd.f32 %v2822_v52, %v2821_v49  ;;  %v2824_v55 = vpop.f32.mrb[18].mxu1  ;;  %v2803_v56 = vpop.f32.mrb[19].mxu0 }
 0x1c2   :  { %v2027_v57 = vadd.f32 %v2801_v51, %v1987_v47  ;;  %v2825_v58 = vpop.f32.mrb[19].mxu1 }
 0x1c4   :  { %v2067_v59 = vadd.f32 %v2823_v54, %v2027_v57 }
 0x1de   :  { %v2843_v60 = vpop.f32.mrb[20].mxu0 }
 0x1df   :  { %v2865_v61 = vpop.f32.mrb[20].mxu1  ;;  %v2844_v63 = vpop.f32.mrb[21].mxu0 }
 0x1e0   :  { %v2845_v0 = vadd.f32 %v2844_v63, %v2843_v60  ;;  %v2866_v1 = vpop.f32.mrb[21].mxu1  ;;  %v2846_v2 = vpop.f32.mrb[22].mxu0 }
 0x1e1   :  { %v2867_v3 = vadd.f32 %v2866_v1, %v2865_v61  ;;  %v2868_v4 = vpop.f32.mrb[22].mxu1  ;;  %v2847_v5 = vpop.f32.mrb[23].mxu0 }
 0x1e2   :  { %v2107_v6 = vadd.f32 %v2845_v0, %v2067_v59  ;;  %v2869_v7 = vpop.f32.mrb[23].mxu1 }
 0x1e4   :  { %v2147_v8 = vadd.f32 %v2867_v3, %v2107_v6 }
 0x1e6   :  { %v2152_v9 = vmax.f32 %v2147_v8, 0.0 }
 0x1e8   :  { %v2153_v10 = vpack.c.bf16 %v2152_v9, %v2152_v9 }
 0x1ea   :  { %2906 = vmatmul.mubr.bf16.vlgmr.msra.gmra.mrb[24].mxu0 %v2153_v10 }
 0x2bd   :  { %v2259_v14 = vpop.f32.mrb[24].mxu0 }
 0x2be   :  { %v2260_v15 = vadd.f32 %v2589_v13, %v2259_v14  ;;  %v2907_v16 = vpop.f32.mrb[25].mxu0 }
 0x2bf   :  { %v2262_v17 = vpop.f32.mrb[26].mxu0 }
 0x2c0   :  { %v2265_v18 = vmax.f32 %v2260_v15, 0.0  ;;  %v2908_v19 = vpop.f32.mrb[27].mxu0 }
 0x2c2   :  { %v2266_v20 = vpack.c.bf16 %v2265_v18, %v2265_v18 }
 0x2c4   :  { %2926 = vmatmul.mubr.bf16.vlgmr.msra.gmra.mrb[24].mxu1 %v2266_v20 }
 0x397   :  { %v2372_v62 = vpop.f32.mrb[24].mxu1 }
 0x398   :  { %v2373_v22 = vadd.f32 %v2598_v21, %v2372_v62  ;;  %v2927_v23 = vpop.f32.mrb[25].mxu1 }
 0x399   :  { %v2375_v24 = vpop.f32.mrb[26].mxu1 }
 0x39a   :  { %2378 = vst [vmem:[#allocation10] sm:$0xff] %v2373_v22  ;;  %v2928_v25 = vpop.f32.mrb[27].mxu1 }
 0x39b   :  { %3245 = shalt.err (!%p3242_p8)
}
 0x39c   :  { %s3246_s6 = scalar_lea.hbm %s3416_s7, 128 }
 0x39d   :  { %p3247_p9 = scmp.ne.s32.totalorder %s3416_s7, %s3246_s6  ;;  %p3250_p10 = scmp.lt.u32.totalorder %s3246_s6, %s3416_s7 }
 0x39f   :  { %p3252_p11 = pnand %p3250_p10, %p3247_p9 }
 0x3a1   :  { %3255 = shalt.err (!%p3252_p11)
}
 0x3a2   :  { %2388 = dma.vmem_to_hbm [thread:$0]  %s2386_s29, 128, %s3416_s7, [#allocation4]  }
 0x3a3   :  { %3262 = dma.done.wait [#allocation4], 128  }
 0x3a4   :  { %3263 = vsyncadd [#allocation4], 4294967168 }
 0x3a5   :  { %2392 = vsyncpa [#allocation3], 1 }
 0x3a6   :  { %2393 = vsyncpa [#allocation6], 1 }
 0x3a7   :  { %2394 = vsyncpa [#allocation9], 1 }
 0x3a8   :  { %2395 = vsyncpa [#allocation4], 1 }

</bundles_post_ra>
